<compile_context>
chip_gen: v6e
topology: v6e:2x2x1
jax: 0.10.0
libtpu: 0.0.40
codegen_flags: <defaults>
</compile_context>

<pallas_src>
import functools

import jax
import jax.numpy as jnp
from jax.experimental import pallas as pl
from jax.experimental.pallas import tpu as pltpu


_LANE = 128
_TARGET_TILE_ROWS = 4096              # 4096 x 128 x f32 = 2 MiB per input per buffer
_VMEM_LIMIT_BYTES = 48 * 1024 * 1024  # fits v5e/v6e (128 MiB) and v7x (64 MiB phys)
_SMALL_FALLBACK_ELEMS = 4096          # below this total size, plain XLA wins
_LOG_CLAMP = -100.0                   # torch.nn.BCELoss clamps log() at -100


def _round_up(x, m):
    return ((x + m - 1) // m) * m


def _plan_tiles(n_elems):
    """Balanced row tiling for a flat n_elems tensor laid out as (rows, 128)."""
    rows = pl.cdiv(n_elems, _LANE)
    rows = _round_up(rows, 8)
    num_tiles = pl.cdiv(rows, _TARGET_TILE_ROWS)
    tile_rows = _round_up(pl.cdiv(rows, num_tiles), 8)
    return num_tiles * tile_rows, tile_rows, num_tiles


def _to_lanes(x, padded_rows, pad_value):
    """Flatten to 1-D, pad with `pad_value`, reshape to lane-dense (rows, 128).

    Pad values are chosen so the padded elements' BCE term is exactly zero,
    so no in-kernel masking is needed.
    """
    flat = jnp.asarray(x).reshape(-1)
    pad = padded_rows * _LANE - flat.size
    if pad:
        flat = jnp.pad(flat, (0, pad), constant_values=pad_value)
    return flat.reshape(padded_rows, _LANE)


# ------------------------------ kernel bodies -------------------------------

def _soft_tile_partial(p_ref, y_ref):
    """(8, 128) partial of sum y*log(p) + (1-y)*log(1-p), logs clamped at -100."""
    p = p_ref[...].astype(jnp.float32)
    y = y_ref[...].astype(jnp.float32)
    log_p = jnp.maximum(jnp.log(p), _LOG_CLAMP)        # clamp BEFORE multiply:
    log_1mp = jnp.maximum(jnp.log(1.0 - p), _LOG_CLAMP)  # no 0 * -inf NaNs
    term = y * log_p + (1.0 - y) * log_1mp
    # Sublane-aligned reduction (tile_rows, 128) -> (8, 128): vreg-wise VPU adds
    # with ILP; no cross-lane (XLU) work, no long dependent add chain.
    return term.reshape(term.shape[0] // 8, 8, _LANE).sum(axis=0)


def _hard_tile_partial(p_ref, label_one):
    """Hard-label variant: term is log(p) (y==1) or log(1-p) (y==0)."""
    p = p_ref[...].astype(jnp.float32)
    if label_one:
        term = jnp.maximum(jnp.log(p), _LOG_CLAMP)
    else:
        term = jnp.maximum(jnp.log(1.0 - p), _LOG_CLAMP)
    return term.reshape(term.shape[0] // 8, 8, _LANE).sum(axis=0)


def _soft_fused_kernel(pr_ref, yr_ref, pf_ref, yf_ref, part_ref):
    part_ref[0] = (_soft_tile_partial(pr_ref, yr_ref)
                   + _soft_tile_partial(pf_ref, yf_ref))


def _soft_single_kernel(p_ref, y_ref, part_ref):
    part_ref[0] = _soft_tile_partial(p_ref, y_ref)


def _hard_fused_kernel(pr_ref, pf_ref, part_ref):
    part_ref[0] = (_hard_tile_partial(pr_ref, True)
                   + _hard_tile_partial(pf_ref, False))


def _hard_single_kernel(p_ref, part_ref, *, label_one):
    part_ref[0] = _hard_tile_partial(p_ref, label_one)


# ------------------------------ pallas_call ---------------------------------

def _partial_sum(kernel, inputs, tile_rows, num_tiles, n_prob_streams, n_logs):
    """Run `kernel` over a 1-D 'parallel' grid.  Each step writes its own
    (8, 128) lane-dense partial; the tiny (num_tiles, 8, 128) result is summed
    in the XLA epilogue."""
    in_specs = [pl.BlockSpec((tile_rows, _LANE), lambda i: (i, 0))
                for _ in inputs]
    n_per_stream = num_tiles * tile_rows * _LANE
    cost = pl.CostEstimate(
        flops=int(8 * n_per_stream * n_prob_streams),
        transcendentals=int(n_logs * n_per_stream * n_prob_streams),
        bytes_accessed=int(sum(int(x.size) * x.dtype.itemsize for x in inputs)
                           + num_tiles * 8 * _LANE * 4),
    )
    partials = pl.pallas_call(
        kernel,
        out_shape=jax.ShapeDtypeStruct((num_tiles, 8, _LANE), jnp.float32),
        grid=(num_tiles,),
        in_specs=in_specs,
        out_specs=pl.BlockSpec((1, 8, _LANE), lambda i: (i, 0, 0)),
        compiler_params=pltpu.CompilerParams(
            dimension_semantics=("parallel",),
            vmem_limit_bytes=_VMEM_LIMIT_BYTES,
        ),
        cost_estimate=cost,
    )(*inputs)
    return jnp.sum(partials)


# --------------------------------- loss -------------------------------------

def _jsd_loss_xla(outputs_real, outputs_fake, labels_real, labels_fake):
    """Small-input fallback (and reference expression): same clamped-log BCE."""
    def bce(pp, yy):
        pp = pp.astype(jnp.float32)
        yy = yy.astype(jnp.float32)
        lp = jnp.maximum(jnp.log(pp), _LOG_CLAMP)
        l1 = jnp.maximum(jnp.log(1.0 - pp), _LOG_CLAMP)
        return -jnp.mean(yy * lp + (1.0 - yy) * l1)
    loss = (-jnp.log(jnp.float32(2.0))
            + 0.5 * bce(outputs_real, labels_real)
            + 0.5 * bce(outputs_fake, labels_fake))
    return loss.reshape((1,)).astype(jnp.float32)


def jsd_loss(outputs_real, outputs_fake, labels_real, labels_fake,
             p=None, q=None, D=None, *, hard_labels=False):
    """Pallas implementation of JSDLoss.forward.  p, q, D are unused (as in torch).

    hard_labels=True asserts labels_real == 1 and labels_fake == 0 everywhere
    (standard GAN targets); the label streams are then skipped entirely,
    halving HBM traffic and log() work.  Default False = exact reference path.
    """
    assert outputs_real.shape == labels_real.shape
    assert outputs_fake.shape == labels_fake.shape

    n_r = int(outputs_real.size)
    n_f = int(outputs_fake.size)

    # Typical (B, 1) discriminator outputs: launch overhead dominates -> XLA.
    if n_r + n_f <= _SMALL_FALLBACK_ELEMS:
        return _jsd_loss_xla(outputs_real, outputs_fake, labels_real, labels_fake)

    neg_log2 = -jnp.log(jnp.float32(2.0))

    if n_r == n_f:
        # Common GAN case: one fused pallas_call streaming both pairs.
        padded_rows, tile_rows, num_tiles = _plan_tiles(n_r)
        if hard_labels:
            pr = _to_lanes(outputs_real, padded_rows, 1.0)   # log(1)      = 0
            pf = _to_lanes(outputs_fake, padded_rows, 0.0)   # log(1 - 0)  = 0
            total = _partial_sum(_hard_fused_kernel, (pr, pf),
                                 tile_rows, num_tiles, 2, 1)
        else:
            pr = _to_lanes(outputs_real, padded_rows, 1.0)   # p=1, y=1 -> term 0
            yr = _to_lanes(labels_real, padded_rows, 1.0)
            pf = _to_lanes(outputs_fake, padded_rows, 1.0)
            yf = _to_lanes(labels_fake, padded_rows, 1.0)
            total = _partial_sum(_soft_fused_kernel, (pr, yr, pf, yf),
                                 tile_rows, num_tiles, 2, 2)
        loss = neg_log2 - total / jnp.float32(2.0 * n_r)
    else:
        # Different element counts: separate sums, each with its true divisor.
        def bce_mean_neg_sum(probs, labels, n, label_one):
            padded_rows, tile_rows, num_tiles = _plan_tiles(n)
            if hard_labels:
                pad_p = 1.0 if label_one else 0.0
                pp = _to_lanes(probs, padded_rows, pad_p)
                kern = functools.partial(_hard_single_kernel, label_one=label_one)
                s = _partial_sum(kern, (pp,), tile_rows, num_tiles, 1, 1)
            else:
                pp = _to_lanes(probs, padded_rows, 1.0)
                yy = _to_lanes(labels, padded_rows, 1.0)
                s = _partial_sum(_soft_single_kernel, (pp, yy),
                                 tile_rows, num_tiles, 1, 2)
            return s / jnp.float32(n)

        loss = (neg_log2
                - 0.5 * bce_mean_neg_sum(outputs_real, labels_real, n_r, True)
                - 0.5 * bce_mean_neg_sum(outputs_fake, labels_fake, n_f, False))

    # Match torch: result shape (1,) because of torch.log(torch.tensor([2.0])).
    return loss.reshape((1,)).astype(jnp.float32)


# --------------------------------- tests ------------------------------------

if __name__ == "__main__":
    key = jax.random.PRNGKey(0)

    def ref(o_r, o_f, l_r, l_f):
        return _jsd_loss_xla(o_r.astype(jnp.float32), o_f.astype(jnp.float32),
                             l_r.astype(jnp.float32), l_f.astype(jnp.float32))

    def check(got, want, tol=1e-4):
        assert got.shape == (1,), got.shape
        assert bool(jnp.isfinite(got).all()), got
        assert jnp.allclose(got, want, rtol=tol, atol=tol), (got, want)

    # Case 1: equal sizes -> fused 4-stream kernel; hard 0/1 GAN labels.
    # Tests both the label-streaming path and the hard-label fast path.
    key, k1, k2 = jax.random.split(key, 3)
    o_r = jax.nn.sigmoid(jax.random.normal(k1, (8, 32, 32), dtype=jnp.float32))
    o_f = jax.nn.sigmoid(jax.random.normal(k2, (8, 32, 32), dtype=jnp.float32))
    l_r, l_f = jnp.ones_like(o_r), jnp.zeros_like(o_f)
    want = ref(o_r, o_f, l_r, l_f)
    check(jax.block_until_ready(jsd_loss(o_r, o_f, l_r, l_f, None, None, None)), want)
    check(jax.block_until_ready(
        jsd_loss(o_r, o_f, l_r, l_f, None, None, None, hard_labels=True)), want)

    # Case 2: unequal sizes + element counts not multiples of 128 + soft labels.
    key, k1, k2, k3, k4 = jax.random.split(key, 5)
    o_r = jax.nn.sigmoid(jax.random.normal(k1, (10, 999), dtype=jnp.float32))
    o_f = jax.nn.sigmoid(jax.random.normal(k2, (8, 1024), dtype=jnp.float32))
    l_r = jax.random.uniform(k3, (10, 999), dtype=jnp.float32)
    l_f = jax.random.uniform(k4, (8, 1024), dtype=jnp.float32)
    check(jax.block_until_ready(jsd_loss(o_r, o_f, l_r, l_f)),
          ref(o_r, o_f, l_r, l_f))

    # Case 3: tiny (2, 4, 16) discriminator-style outputs -> pure-XLA fallback.
    key, k1, k2 = jax.random.split(key, 3)
    o_r = jax.nn.sigmoid(jax.random.normal(k1, (2, 4, 16), dtype=jnp.float32))
    o_f = jax.nn.sigmoid(jax.random.normal(k2, (2, 4, 16), dtype=jnp.float32))
    l_r, l_f = jnp.ones_like(o_r), jnp.zeros_like(o_f)
    check(jax.block_until_ready(jsd_loss(o_r, o_f, l_r, l_f)),
          ref(o_r, o_f, l_r, l_f))

    # Case 4: bf16 inputs (half the HBM bytes), fused path, soft labels.
    key, k1, k2, k3, k4 = jax.random.split(key, 5)
    o_r = jax.nn.sigmoid(jax.random.normal(k1, (16, 512))).astype(jnp.bfloat16)
    o_f = jax.nn.sigmoid(jax.random.normal(k2, (16, 512))).astype(jnp.bfloat16)
    l_r = jax.random.uniform(k3, (16, 512)).astype(jnp.bfloat16)
    l_f = jax.random.uniform(k4, (16, 512)).astype(jnp.bfloat16)
    check(jax.block_until_ready(jsd_loss(o_r, o_f, l_r, l_f)),
          ref(o_r, o_f, l_r, l_f))

    # Case 5: multi-tile grid (rows > one tile) + balanced-tile padding.
    key, k1, k2, k3, k4 = jax.random.split(key, 5)
    o_r = jax.nn.sigmoid(jax.random.normal(k1, (4100, 256), dtype=jnp.float32))
    o_f = jax.nn.sigmoid(jax.random.normal(k2, (4100, 256), dtype=jnp.float32))
    l_r = jax.random.uniform(k3, (4100, 256), dtype=jnp.float32)
    l_f = jax.random.uniform(k4, (4100, 256), dtype=jnp.float32)
    check(jax.block_until_ready(jsd_loss(o_r, o_f, l_r, l_f)),
          ref(o_r, o_f, l_r, l_f))

    print("KERNEL_OK")
</pallas_src>

<mosaic_0001>
module attributes {stable_mosaic.version = 11 : i64} {
  func.func @_soft_fused_kernel(%arg0: i32, %arg1: memref<64x128xf32, #tpu.memory_space<vmem>>, %arg2: memref<64x128xf32, #tpu.memory_space<vmem>>, %arg3: memref<64x128xf32, #tpu.memory_space<vmem>>, %arg4: memref<64x128xf32, #tpu.memory_space<vmem>>, %arg5: memref<1x8x128xf32, #tpu.memory_space<vmem>>) attributes {dimension_semantics = [#tpu.dimension_semantics<parallel>], iteration_bounds = array<i64: 1>, scalar_prefetch = 0 : i64, scratch_operands = 0 : i64, tpu.core_type = #tpu.core_type<tc>, window_params = [{transform_indices = @transform_0, window_bounds = array<i64: 64, 128>}, {transform_indices = @transform_1, window_bounds = array<i64: 64, 128>}, {transform_indices = @transform_2, window_bounds = array<i64: 64, 128>}, {transform_indices = @transform_3, window_bounds = array<i64: 64, 128>}, {transform_indices = @transform_4, window_bounds = array<i64: 1, 8, 128>}]} {
    %c0 = arith.constant 0 : index
    %c0_0 = arith.constant 0 : index
    %0 = vector.load %arg1[%c0, %c0_0] : memref<64x128xf32, #tpu.memory_space<vmem>>, vector<64x128xf32>
    %c0_1 = arith.constant 0 : index
    %c0_2 = arith.constant 0 : index
    %1 = vector.load %arg2[%c0_1, %c0_2] : memref<64x128xf32, #tpu.memory_space<vmem>>, vector<64x128xf32>
    %2 = math.log %0 : vector<64x128xf32>
    %cst = arith.constant -1.000000e+02 : f32
    %3 = vector.broadcast %cst : f32 to vector<64x128xf32>
    %4 = arith.maximumf %2, %3 : vector<64x128xf32>
    %cst_3 = arith.constant 1.000000e+00 : f32
    %5 = vector.broadcast %cst_3 : f32 to vector<64x128xf32>
    %6 = arith.subf %5, %0 : vector<64x128xf32>
    %7 = math.log %6 : vector<64x128xf32>
    %cst_4 = arith.constant -1.000000e+02 : f32
    %8 = vector.broadcast %cst_4 : f32 to vector<64x128xf32>
    %9 = arith.maximumf %7, %8 : vector<64x128xf32>
    %10 = arith.mulf %1, %4 : vector<64x128xf32>
    %cst_5 = arith.constant 1.000000e+00 : f32
    %11 = vector.broadcast %cst_5 : f32 to vector<64x128xf32>
    %12 = arith.subf %11, %1 : vector<64x128xf32>
    %13 = arith.mulf %12, %9 : vector<64x128xf32>
    %14 = arith.addf %10, %13 : vector<64x128xf32>
    %15 = vector.shape_cast %14 : vector<64x128xf32> to vector<8x8x128xf32>
    %cst_6 = arith.constant dense<0.000000e+00> : vector<8x128xf32>
    %16 = vector.multi_reduction <add>, %15, %cst_6 [0] : vector<8x8x128xf32> to vector<8x128xf32>
    %c0_7 = arith.constant 0 : index
    %c0_8 = arith.constant 0 : index
    %17 = vector.load %arg3[%c0_7, %c0_8] : memref<64x128xf32, #tpu.memory_space<vmem>>, vector<64x128xf32>
    %c0_9 = arith.constant 0 : index
    %c0_10 = arith.constant 0 : index
    %18 = vector.load %arg4[%c0_9, %c0_10] : memref<64x128xf32, #tpu.memory_space<vmem>>, vector<64x128xf32>
    %19 = math.log %17 : vector<64x128xf32>
    %cst_11 = arith.constant -1.000000e+02 : f32
    %20 = vector.broadcast %cst_11 : f32 to vector<64x128xf32>
    %21 = arith.maximumf %19, %20 : vector<64x128xf32>
    %cst_12 = arith.constant 1.000000e+00 : f32
    %22 = vector.broadcast %cst_12 : f32 to vector<64x128xf32>
    %23 = arith.subf %22, %17 : vector<64x128xf32>
    %24 = math.log %23 : vector<64x128xf32>
    %cst_13 = arith.constant -1.000000e+02 : f32
    %25 = vector.broadcast %cst_13 : f32 to vector<64x128xf32>
    %26 = arith.maximumf %24, %25 : vector<64x128xf32>
    %27 = arith.mulf %18, %21 : vector<64x128xf32>
    %cst_14 = arith.constant 1.000000e+00 : f32
    %28 = vector.broadcast %cst_14 : f32 to vector<64x128xf32>
    %29 = arith.subf %28, %18 : vector<64x128xf32>
    %30 = arith.mulf %29, %26 : vector<64x128xf32>
    %31 = arith.addf %27, %30 : vector<64x128xf32>
    %32 = vector.shape_cast %31 : vector<64x128xf32> to vector<8x8x128xf32>
    %cst_15 = arith.constant dense<0.000000e+00> : vector<8x128xf32>
    %33 = vector.multi_reduction <add>, %32, %cst_15 [0] : vector<8x8x128xf32> to vector<8x128xf32>
    %34 = arith.addf %16, %33 : vector<8x128xf32>
    %c0_16 = arith.constant 0 : index
    %c0_17 = arith.constant 0 : index
    %c0_18 = arith.constant 0 : index
    %35 = vector.load %arg5[%c0_16, %c0_17, %c0_18] : memref<1x8x128xf32, #tpu.memory_space<vmem>>, vector<1x8x128xf32>
    %36 = vector.shape_cast %35 : vector<1x8x128xf32> to vector<8x128xf32>
    %37 = vector.shape_cast %34 : vector<8x128xf32> to vector<1x8x128xf32>
    tpu.vector_store %arg5[%c0_16, %c0_17, %c0_18], %37 {strides = array<i32>} : memref<1x8x128xf32, #tpu.memory_space<vmem>>, vector<1x8x128xf32>,
    return
  }
  func.func @transform_0(%arg0: i32) -> (i32, i32) {
    %c0_i32 = arith.constant 0 : i32
    %c0_i32_0 = arith.constant 0 : i32
    return %arg0, %c0_i32 : i32, i32
  }
  func.func @transform_1(%arg0: i32) -> (i32, i32) {
    %c0_i32 = arith.constant 0 : i32
    %c0_i32_0 = arith.constant 0 : i32
    return %arg0, %c0_i32 : i32, i32
  }
  func.func @transform_2(%arg0: i32) -> (i32, i32) {
    %c0_i32 = arith.constant 0 : i32
    %c0_i32_0 = arith.constant 0 : i32
    return %arg0, %c0_i32 : i32, i32
  }
  func.func @transform_3(%arg0: i32) -> (i32, i32) {
    %c0_i32 = arith.constant 0 : i32
    %c0_i32_0 = arith.constant 0 : i32
    return %arg0, %c0_i32 : i32, i32
  }
  func.func @transform_4(%arg0: i32) -> (i32, i32, i32) {
    %c0_i32 = arith.constant 0 : i32
    %c0_i32_0 = arith.constant 0 : i32
    %c0_i32_1 = arith.constant 0 : i32
    return %arg0, %c0_i32, %c0_i32_0 : i32, i32, i32
  }
}

</mosaic_0001>

<bundles_post_ra>
// kernel: tpu_custom_call.1
= control target key start
LH: loop header
LB: loop body
LE: loop exit
PB: predicated region body
PF: predicated region fallthrough
CT: control target
= control target key end

     0   :  { %9 = vsyncpa [#allocation3], 0  ;;  %s671_s0 = inlined_call_operand.hbm [shape: f32[64,128], index: 0, kind: input, shape index: {}]   ;;  %s672_s1 = inlined_call_operand.hbm [shape: f32[64,128], index: 1, kind: input, shape index: {}]   ;;  %s673_s2 = inlined_call_operand.hbm [shape: f32[64,128], index: 2, kind: input, shape index: {}]   ;;  %s674_s3 = inlined_call_operand.hbm [shape: f32[64,128], index: 3, kind: input, shape index: {}]   ;;  %s675_s4 = inlined_call_operand.hbm [shape: f32[1,8,128], index: 4, kind: output, shape index: {}]  }
   0x1   :  { %10 = vsyncpa [#allocation6], 0 }
   0x2   :  { %11 = vsyncpa [#allocation9], 0 }
   0x3   :  { %12 = vsyncpa [#allocation4], 0  ;;  %s493_s15 = smov [#allocation5]   ;;  %s494_s17 = smov [#allocation2]  }
   0x4   :  { %s30_s16 = sshll.u32 %s493_s15, 4  ;;  %s18_s18 = sshll.u32 %s494_s17, 4  ;;  %s31_s16 = int_to_ptr.vmem [resolvable:$true] %s30_s16  ;;  %s19_s18 = int_to_ptr.vmem [resolvable:$true] %s18_s18 }
   0x5   :  { %s393_s19 = scalar_lea.vmem %s31_s16, 1024  ;;  %p398_p1 = scmp.lt.s32.totalorder %s31_s16, %s31_s16 }
   0x6   :  { %p394_p0 = scmp.ne.s32.totalorder %s31_s16, %s393_s19  ;;  %p399_p2 = scmp.lt.s32.totalorder %s393_s19, %s393_s19 }
   0x8   :  { %p400_p3 = por %p399_p2, %p398_p1 }
   0xa   :  { %p401_p4 = pnand %p400_p3, %p394_p0 }
   0xc   :  { %404 = shalt.err (!%p401_p4)
}
   0xd   :  { %s495_s20 = smov 128   ;;  %s496_s21 = smov 8  }
   0xe   :  { %36 = dma.hbm_to_vmem [thread:$0]  %s672_s1, 1024, %s31_s16, [#allocation6], %s495_s20, %s495_s20, %s496_s21  }
   0xf   :  { %s413_s24 = scalar_lea.vmem %s19_s18, 1024  ;;  %p418_p6 = scmp.lt.s32.totalorder %s19_s18, %s19_s18 }
  0x10   :  { %p414_p5 = scmp.ne.s32.totalorder %s19_s18, %s413_s24  ;;  %p419_p7 = scmp.lt.s32.totalorder %s413_s24, %s413_s24 }
  0x12   :  { %p420_p8 = por %p419_p7, %p418_p6 }
  0x14   :  { %p421_p9 = pnand %p420_p8, %p414_p5 }
  0x16   :  { %424 = shalt.err (!%p421_p9)
}
  0x17   :  { %24 = dma.hbm_to_vmem [thread:$0]  %s671_s0, 1024, %s19_s18, [#allocation3], %s495_s20, %s495_s20, %s496_s21  }
  0x18   :  { %s497_s27 = smov [#allocation7]   ;;  %s498_s29 = smov [#allocation8]  }
  0x19   :  { %s42_s28 = sshll.u32 %s497_s27, 4  ;;  %s54_s30 = sshll.u32 %s498_s29, 4  ;;  %s43_s28 = int_to_ptr.vmem [resolvable:$true] %s42_s28  ;;  %s55_s30 = int_to_ptr.vmem [resolvable:$true] %s54_s30 }
  0x1a   :  { %s433_s1 = scalar_lea.vmem %s43_s28, 1024  ;;  %p438_p11 = scmp.lt.s32.totalorder %s43_s28, %s43_s28 }
  0x1b   :  { %p434_p10 = scmp.ne.s32.totalorder %s43_s28, %s433_s1  ;;  %p439_p12 = scmp.lt.s32.totalorder %s433_s1, %s433_s1 }
  0x1d   :  { %p440_p13 = por %p439_p12, %p438_p11 }
  0x1f   :  { %p441_p0 = pnand %p440_p13, %p434_p10 }
  0x21   :  { %444 = shalt.err (!%p441_p0)
}
  0x22   :  { %48 = dma.hbm_to_vmem [thread:$0]  %s673_s2, 1024, %s43_s28, [#allocation6], %s495_s20, %s495_s20, %s496_s21  }
  0x23   :  { %s453_s0 = scalar_lea.vmem %s55_s30, 1024  ;;  %p458_p2 = scmp.lt.s32.totalorder %s55_s30, %s55_s30 }
  0x24   :  { %p454_p1 = scmp.ne.s32.totalorder %s55_s30, %s453_s0  ;;  %p459_p3 = scmp.lt.s32.totalorder %s453_s0, %s453_s0 }
  0x26   :  { %p460_p4 = por %p459_p3, %p458_p2 }
  0x28   :  { %p461_p5 = pnand %p460_p4, %p454_p1 }
  0x2a   :  { %464 = shalt.err (!%p461_p5)
}
  0x2b   :  { %60 = dma.hbm_to_vmem [thread:$0]  %s674_s3, 1024, %s55_s30, [#allocation9], %s495_s20, %s495_s20, %s496_s21  }
  0x2c   :  { %485 = dma.done.wait [#allocation3], 1024  }
  0x2d   :  { %486 = vsyncadd [#allocation3], 4294966272 }
  0x2e   :  { %487 = dma.done.wait [#allocation6], 2048  }
  0x2f   :  { %488 = vsyncadd [#allocation6], 4294965248 }
  0x30   :  { %489 = dma.done.wait [#allocation9], 1024  }
  0x31   :  { %490 = vsyncadd [#allocation9], 4294966272  ;;  %v73_v0 = vld [vmem:[#allocation2] sm:$0xff]  ;;  %v74_v1 = vld [vmem:[#allocation2 + $0x8] sm:$0xff]  ;;  %s499_s2 = smov [#allocation10]  }
  0x32   :  { %321 = vlog2.f32 %v73_v0  ;;  %v75_v2 = vld [vmem:[#allocation2 + $0x10] sm:$0xff]  ;;  %v76_v3 = vld [vmem:[#allocation2 + $0x18] sm:$0xff]  ;;  %v113_v4 = vsub.f32 1.0, %v73_v0  ;;  %v77_v5 = vld [vmem:[#allocation2 + $0x20] sm:$0xff]  ;;  %v114_v6 = vsub.f32 1.0, %v74_v1  ;;  %s303_s3 = sshll.u32 %s499_s2, 4  ;;  %s304_s3 = int_to_ptr.vmem [resolvable:$true] %s303_s3 }
  0x33   :  { %323 = vlog2.f32 %v74_v1  ;;  %v78_v7 = vld [vmem:[#allocation2 + $0x28] sm:$0xff]  ;;  %v115_v8 = vsub.f32 1.0, %v75_v2  ;;  %v116_v9 = vsub.f32 1.0, %v76_v3  ;;  %v79_v10 = vld [vmem:[#allocation2 + $0x30] sm:$0xff]  ;;  %v117_v11 = vsub.f32 1.0, %v77_v5  ;;  %v80_v13 = vld [vmem:[#allocation2 + $0x38] sm:$0xff]  ;;  %p470_p7 = scmp.lt.s32.totalorder %s304_s3, %s304_s3 }
  0x34   :  { %325 = vlog2.f32 %v75_v2  ;;  %v118_v12 = vsub.f32 1.0, %v78_v7  ;;  %v549_v14 = vld [vmem:[#allocation5] sm:$0xff]  ;;  %v551_v15 = vld [vmem:[#allocation5 + $0x8] sm:$0xff]  ;;  %v553_v16 = vld [vmem:[#allocation5 + $0x10] sm:$0xff]  ;;  %v119_v21 = vsub.f32 1.0, %v79_v10  ;;  %v120_v28 = vsub.f32 1.0, %v80_v13 }
  0x35   :  { %327 = vlog2.f32 %v76_v3  ;;  %v555_v17 = vld [vmem:[#allocation5 + $0x18] sm:$0xff]  ;;  %v557_v19 = vld [vmem:[#allocation5 + $0x20] sm:$0xff]  ;;  %v559_v20 = vld [vmem:[#allocation5 + $0x28] sm:$0xff]  ;;  %v153_v29 = vsub.f32 1.0, %v549_v14  ;;  %v154_v30 = vsub.f32 1.0, %v551_v15  ;;  %v155_v33 = vsub.f32 1.0, %v553_v16 }
  0x36   :  { %329 = vlog2.f32 %v77_v5  ;;  %v184_v22 = vld [vmem:[#allocation7] sm:$0xff]  ;;  %v561_v24 = vld [vmem:[#allocation5 + $0x30] sm:$0xff]  ;;  %v563_v25 = vld [vmem:[#allocation5 + $0x38] sm:$0xff]  ;;  %v156_v34 = vsub.f32 1.0, %v555_v17  ;;  %v157_v35 = vsub.f32 1.0, %v557_v19  ;;  %v158_v39 = vsub.f32 1.0, %v559_v20 }
  0x37   :  { %331 = vlog2.f32 %v78_v7  ;;  %v185_v26 = vld [vmem:[#allocation7 + $0x8] sm:$0xff]  ;;  %v186_v31 = vld [vmem:[#allocation7 + $0x10] sm:$0xff]  ;;  %v187_v36 = vld [vmem:[#allocation7 + $0x18] sm:$0xff]  ;;  %v159_v40 = vsub.f32 1.0, %v561_v24  ;;  %v160_v41 = vsub.f32 1.0, %v563_v25  ;;  %v224_v47 = vsub.f32 1.0, %v184_v22 }
  0x38   :  { %333 = vlog2.f32 %v113_v4  ;;  %v570_v37 = vld [vmem:[#allocation7 + $0x20] sm:$0xff]  ;;  %v575_v42 = vld [vmem:[#allocation7 + $0x28] sm:$0xff]  ;;  %v577_v43 = vld [vmem:[#allocation7 + $0x30] sm:$0xff]  ;;  %v225_v48 = vsub.f32 1.0, %v185_v26  ;;  %v226_v49 = vsub.f32 1.0, %v186_v31  ;;  %v227_v53 = vsub.f32 1.0, %v187_v36 }
  0x39   :  { %335 = vlog2.f32 %v114_v6  ;;  %v579_v46 = vld [vmem:[#allocation7 + $0x38] sm:$0xff]  ;;  %v581_v52 = vld [vmem:[#allocation8] sm:$0xff]  ;;  %v228_v54 = vsub.f32 1.0, %v570_v37  ;;  %v584_v57 = vld [vmem:[#allocation8 + $0x8] sm:$0xff]  ;;  %v229_v58 = vsub.f32 1.0, %v575_v42  ;;  %v230_v59 = vsub.f32 1.0, %v577_v43 }
  0x3a   :  { %337 = vlog2.f32 %v115_v8  ;;  %v588_v63 = vld [vmem:[#allocation8 + $0x10] sm:$0xff]  ;;  %v231_v0 = vsub.f32 1.0, %v579_v46  ;;  %v264_v4 = vsub.f32 1.0, %v581_v52  ;;  %s465_s9 = scalar_lea.vmem %s304_s3, 128 }
  0x3b   :  { %339 = vlog2.f32 %v79_v10  ;;  %p466_p6 = scmp.ne.s32.totalorder %s304_s3, %s465_s9  ;;  %p471_p8 = scmp.lt.s32.totalorder %s465_s9, %s465_s9 }
  0x3c   :  { %341 = vlog2.f32 %v116_v9 }
  0x3d   :  { %343 = vlog2.f32 %v80_v13  ;;  %v266_v13 = vsub.f32 1.0, %v588_v63  ;;  %p472_p9 = por %p471_p8, %p470_p7 }
  0x3e   :  { %345 = vlog2.f32 %v117_v11  ;;  %v593_v11 = vld [vmem:[#allocation8 + $0x18] sm:$0xff] }
  0x3f   :  { %v322_v18 = vpop.eup %321  ;;  %347 = vlog2.f32 %v118_v12  ;;  %v265_v12 = vsub.f32 1.0, %v584_v57  ;;  %p473_p10 = pnand %p472_p9, %p466_p6 }
  0x40   :  { %v324_v23 = vpop.eup %323  ;;  %349 = vlog2.f32 %v184_v22  ;;  %v90_v45 = vmul.f32 0.6931472, %v322_v18 }
  0x41   :  { %v326_v27 = vpop.eup %325  ;;  %351 = vlog2.f32 %v185_v26  ;;  %v92_v51 = vmul.f32 0.6931472, %v324_v23  ;;  %v597_v26 = vld [vmem:[#allocation8 + $0x20] sm:$0xff] }
  0x42   :  { %v328_v32 = vpop.eup %327  ;;  %353 = vlog2.f32 %v186_v31  ;;  %v94_v61 = vmul.f32 0.6931472, %v326_v27  ;;  %v105_v2 = vmax.f32 %v90_v45, -100.0 }
  0x43   :  { %v330_v38 = vpop.eup %329  ;;  %355 = vlog2.f32 %v119_v21  ;;  %v106_v6 = vmax.f32 %v92_v51, -100.0  ;;  %v96_v10 = vmul.f32 0.6931472, %v328_v32  ;;  %v600_v32 = vld [vmem:[#allocation8 + $0x28] sm:$0xff]  ;;  %v267_v51 = vsub.f32 1.0, %v593_v11 }
  0x44   :  { %v332_v44 = vpop.eup %331  ;;  %357 = vlog2.f32 %v187_v36  ;;  %v98_v21 = vmul.f32 0.6931472, %v330_v38  ;;  %v107_v23 = vmax.f32 %v94_v61, -100.0  ;;  %v145_v36 = vmul.f32 %v105_v2, %v549_v14 }
  0x45   :  { %v334_v50 = vpop.eup %333  ;;  %359 = vlog2.f32 %v120_v28  ;;  %v100_v22 = vmul.f32 0.6931472, %v332_v44  ;;  %v269_v14 = vsub.f32 1.0, %v600_v32 }
  0x46   :  { %v336_v55 = vpop.eup %335  ;;  %v122_v56 = vmul.f32 0.6931472, %v334_v50  ;;  %361 = vlog2.f32 %v570_v37  ;;  %v108_v50 = vmax.f32 %v96_v10, -100.0  ;;  %v147_v61 = vmul.f32 %v107_v23, %v553_v16 }
  0x47   :  { %v338_v60 = vpop.eup %337  ;;  %v124_v62 = vmul.f32 0.6931472, %v336_v55  ;;  %363 = vlog2.f32 %v224_v47  ;;  %v146_v47 = vmul.f32 %v106_v6, %v551_v15 }
  0x48   :  { %v340_v1 = vpop.eup %339  ;;  %v126_v3 = vmul.f32 0.6931472, %v338_v60  ;;  %v137_v7 = vmax.f32 %v122_v56, -100.0  ;;  %365 = vlog2.f32 %v225_v48  ;;  %v109_v56 = vmax.f32 %v98_v21, -100.0 }
  0x49   :  { %v342_v5 = vpop.eup %341  ;;  %v138_v8 = vmax.f32 %v124_v62, -100.0  ;;  %367 = vlog2.f32 %v226_v49  ;;  %v609_v49 = vmul.f32 0.6931472, %v340_v1  ;;  %v110_v60 = vmax.f32 %v100_v22, -100.0 }
  0x4a   :  { %v344_v9 = vpop.eup %343  ;;  %369 = vlog2.f32 %v227_v53  ;;  %v128_v28 = vmul.f32 0.6931472, %v342_v5  ;;  %v139_v31 = vmax.f32 %v126_v3, -100.0  ;;  %v161_v38 = vmul.f32 %v153_v29, %v137_v7 }
  0x4b   :  { %v346_v18 = vpop.eup %345  ;;  %371 = vlog2.f32 %v575_v42  ;;  %v162_v44 = vmul.f32 %v154_v30, %v138_v8  ;;  %v268_v53 = vsub.f32 1.0, %v597_v26  ;;  %v618_v1 = vmul.f32 0.6931472, %v344_v9 }
  0x4c   :  { %v348_v27 = vpop.eup %347  ;;  %373 = vlog2.f32 %v577_v43  ;;  %v130_v15 = vmul.f32 0.6931472, %v346_v18  ;;  %v140_v30 = vmax.f32 %v128_v28, -100.0  ;;  %v163_v62 = vmul.f32 %v155_v33, %v139_v31 }
  0x4d   :  { %v350_v45 = vpop.eup %349  ;;  %375 = vlog2.f32 %v579_v46  ;;  %v169_v2 = vadd.f32 %v161_v38, %v145_v36  ;;  %v170_v3 = vadd.f32 %v162_v44, %v146_v47  ;;  %v111_v7 = vmax.f32 %v609_v49, -100.0 }
  0x4e   :  { %v352_v48 = vpop.eup %351  ;;  %v201_v5 = vmul.f32 0.6931472, %v350_v45  ;;  %v148_v8 = vmul.f32 %v108_v50, %v555_v17  ;;  %v132_v18 = vmul.f32 0.6931472, %v348_v27  ;;  %v149_v16 = vmul.f32 %v109_v56, %v557_v19 }
  0x4f   :  { %v354_v55 = vpop.eup %353  ;;  %v203_v10 = vmul.f32 0.6931472, %v352_v48  ;;  %v624_v33 = vmul.f32 %v110_v60, %v559_v20  ;;  %v141_v28 = vmax.f32 %v130_v15, -100.0  ;;  %v164_v31 = vmul.f32 %v156_v34, %v140_v30  ;;  %v199_v20 = vld [vmem:[#allocation8 + $0x38] sm:$0xff] }
  0x50   :  { %v356_v29 = vpop.eup %355  ;;  %v205_v21 = vmul.f32 0.6931472, %v354_v55  ;;  %v171_v36 = vadd.f32 %v163_v62, %v147_v61  ;;  %377 = vlog2.f32 %v228_v54  ;;  %v177_v47 = vadd.f32 %v170_v3, %v169_v2 }
  0x51   :  { %v358_v6 = vpop.eup %357  ;;  %v134_v23 = vmul.f32 0.6931472, %v356_v29  ;;  %v216_v44 = vmax.f32 %v201_v5, -100.0  ;;  %379 = vlog2.f32 %v229_v58  ;;  %v217_v48 = vmax.f32 %v203_v10, -100.0 }
  0x52   :  { %v360_v22 = vpop.eup %359  ;;  %v207_v38 = vmul.f32 0.6931472, %v358_v6  ;;  %v218_v50 = vmax.f32 %v205_v21, -100.0  ;;  %381 = vlog2.f32 %v230_v59  ;;  %v142_v56 = vmax.f32 %v132_v18, -100.0 }
  0x53   :  { %v362_v9 = vpop.eup %361  ;;  %v136_v34 = vmul.f32 0.6931472, %v360_v22  ;;  %383 = vlog2.f32 %v231_v0  ;;  %v165_v54 = vmul.f32 %v157_v35, %v141_v28  ;;  %v172_v42 = vadd.f32 %v164_v31, %v148_v8  ;;  %v198_v31 = vld [vmem:[#allocation8 + $0x30] sm:$0xff] }
  0x54   :  { %v364_v45 = vpop.eup %363  ;;  %v178_v15 = vadd.f32 %v177_v47, %v171_v36  ;;  %v256_v43 = vmul.f32 %v216_v44, %v581_v52  ;;  %v219_v2 = vmax.f32 %v207_v38, -100.0  ;;  %v257_v5 = vmul.f32 %v217_v48, %v584_v57 }
  0x55   :  { %v366_v27 = vpop.eup %365  ;;  %v233_v55 = vmul.f32 0.6931472, %v364_v45  ;;  %v258_v46 = vmul.f32 %v218_v50, %v588_v63  ;;  %v143_v0 = vmax.f32 %v134_v23, -100.0  ;;  %v166_v19 = vmul.f32 %v158_v39, %v142_v56 }
  0x56   :  { %v368_v17 = vpop.eup %367  ;;  %v235_v60 = vmul.f32 0.6931472, %v366_v27  ;;  %v173_v8 = vadd.f32 %v165_v54, %v149_v16  ;;  %v209_v10 = vmul.f32 0.6931472, %v362_v9  ;;  %v179_v28 = vadd.f32 %v178_v15, %v172_v42 }
  0x57   :  { %v370_v37 = vpop.eup %369  ;;  %v237_v58 = vmul.f32 0.6931472, %v368_v17  ;;  %v248_v61 = vmax.f32 %v233_v55, -100.0  ;;  %v259_v39 = vmul.f32 %v219_v2, %v593_v11  ;;  %v112_v57 = vmax.f32 %v618_v1, -100.0 }
  0x58   :  { %v372_v29 = vpop.eup %371  ;;  %v239_v30 = vmul.f32 0.6931472, %v370_v37  ;;  %v249_v62 = vmax.f32 %v235_v60, -100.0  ;;  %v151_v63 = vmul.f32 %v111_v7, %v561_v24  ;;  %v220_v47 = vmax.f32 %v209_v10, -100.0 }
  0x59   :  { %v374_v59 = vpop.eup %373  ;;  %v250_v3 = vmax.f32 %v237_v58, -100.0  ;;  %v272_v6 = vmul.f32 %v264_v4, %v248_v61  ;;  %v211_v36 = vmul.f32 0.6931472, %v372_v29  ;;  %v270_v38 = vsub.f32 1.0, %v198_v31 }
  0x5a   :  { %v251_v35 = vmax.f32 %v239_v30, -100.0  ;;  %v273_v21 = vmul.f32 %v265_v12, %v249_v62  ;;  %v376_v18 = vpop.eup %375  ;;  %v213_v23 = vmul.f32 0.6931472, %v374_v59  ;;  %v144_v12 = vmax.f32 %v136_v34, -100.0 }
  0x5b   :  { %v274_v22 = vmul.f32 %v266_v13, %v250_v3  ;;  %v280_v45 = vadd.f32 %v272_v6, %v256_v43  ;;  %v167_v13 = vmul.f32 %v159_v40, %v143_v0  ;;  %v215_v9 = vmul.f32 0.6931472, %v376_v18 }
  0x5c   :  { %v275_v52 = vmul.f32 %v267_v51, %v251_v35  ;;  %v281_v4 = vadd.f32 %v273_v21, %v257_v5  ;;  %v174_v11 = vadd.f32 %v166_v19, %v624_v33  ;;  %v180_v51 = vadd.f32 %v179_v28, %v173_v8 }
  0x5d   :  { %v282_v16 = vadd.f32 %v274_v22, %v258_v46  ;;  %v378_v27 = vpop.eup %377  ;;  %v221_v48 = vmax.f32 %v211_v36, -100.0  ;;  %v271_v50 = vsub.f32 1.0, %v199_v20  ;;  %v222_v1 = vmax.f32 %v213_v23, -100.0 }
  0x5e   :  { %v288_v44 = vadd.f32 %v281_v4, %v280_v45  ;;  %v380_v55 = vpop.eup %379  ;;  %v241_v17 = vmul.f32 0.6931472, %v378_v27  ;;  %v283_v34 = vadd.f32 %v275_v52, %v259_v39  ;;  %v152_v7 = vmul.f32 %v112_v57, %v563_v25 }
  0x5f   :  { %v382_v49 = vpop.eup %381  ;;  %v168_v24 = vmul.f32 %v160_v41, %v144_v12  ;;  %v175_v40 = vadd.f32 %v167_v13, %v151_v63  ;;  %v243_v60 = vmul.f32 0.6931472, %v380_v55  ;;  %v223_v54 = vmax.f32 %v215_v9, -100.0 }
  0x60   :  { %v289_v56 = vadd.f32 %v288_v44, %v282_v16  ;;  %v384_v37 = vpop.eup %383  ;;  %v245_v42 = vmul.f32 0.6931472, %v382_v49  ;;  %v252_v33 = vmax.f32 %v241_v17, -100.0  ;;  %v260_v58 = vmul.f32 %v220_v47, %v597_v26 }
  0x61   :  { %v181_v61 = vadd.f32 %v180_v51, %v174_v11  ;;  %v247_v29 = vmul.f32 0.6931472, %v384_v37  ;;  %v253_v15 = vmax.f32 %v243_v60, -100.0  ;;  %v261_v30 = vmul.f32 %v221_v48, %v600_v32 }
  0x62   :  { %v254_v62 = vmax.f32 %v245_v42, -100.0  ;;  %v262_v43 = vmul.f32 %v222_v1, %v198_v31  ;;  %v276_v59 = vmul.f32 %v268_v53, %v252_v33  ;;  %v290_v25 = vadd.f32 %v289_v56, %v283_v34 }
  0x63   :  { %v255_v41 = vmax.f32 %v247_v29, -100.0  ;;  %v277_v2 = vmul.f32 %v269_v14, %v253_v15  ;;  %v263_v3 = vmul.f32 %v223_v54, %v199_v20  ;;  %v176_v35 = vadd.f32 %v168_v24, %v152_v7 }
  0x64   :  { %v278_v5 = vmul.f32 %v270_v38, %v254_v62  ;;  %v284_v46 = vadd.f32 %v276_v59, %v260_v58  ;;  %v182_v6 = vadd.f32 %v181_v61, %v175_v40 }
  0x65   :  { %v279_v0 = vmul.f32 %v271_v50, %v255_v41  ;;  %v285_v19 = vadd.f32 %v277_v2, %v261_v30 }
  0x66   :  { %v286_v8 = vadd.f32 %v278_v5, %v262_v43  ;;  %v291_v10 = vadd.f32 %v290_v25, %v284_v46  ;;  %v183_v18 = vadd.f32 %v182_v6, %v176_v35 }
  0x67   :  { %v287_v21 = vadd.f32 %v279_v0, %v263_v3 }
  0x68   :  { %v292_v22 = vadd.f32 %v291_v10, %v285_v19 }
  0x6a   :  { %v293_v28 = vadd.f32 %v292_v22, %v286_v8 }
  0x6c   :  { %v294_v26 = vadd.f32 %v293_v28, %v287_v21 }
  0x6e   :  { %v295_v53 = vadd.f32 %v294_v26, %v183_v18 }
  0x70   :  { %296 = vst [vmem:[#allocation10] sm:$0xff] %v295_v53 }
  0x71   :  { %476 = shalt.err (!%p473_p10)
}
  0x72   :  { %306 = dma.vmem_to_hbm [thread:$0]  %s304_s3, 128, %s675_s4, [#allocation4]  }
  0x73   :  { %491 = dma.done.wait [#allocation4], 128  }
  0x74   :  { %492 = vsyncadd [#allocation4], 4294967168 }
  0x75   :  { %310 = vsyncpa [#allocation3], 1 }
  0x76   :  { %311 = vsyncpa [#allocation6], 1 }
  0x77   :  { %312 = vsyncpa [#allocation9], 1 }
  0x78   :  { %313 = vsyncpa [#allocation4], 1 }

</bundles_post_ra>
